<compile_context>
chip_gen: v5e
topology: v5e:2x2
jax: 0.10.0
libtpu: 0.0.40
codegen_flags: <defaults>
</compile_context>

<pallas_src>
import jax
import jax.numpy as jnp
from jax.experimental import pallas as pl
from jax.experimental.pallas import tpu as pltpu


def _round_up(x, m):
    return ((x + m - 1) // m) * m


def _round_down(x, m):
    return (x // m) * m


_SLACK = 2 << 20            # headroom for Mosaic-internal scratch
_MAX_TILE_BYTES = 8 << 20   # target per-(tm, E) input tile (hides ~0.35us/step overhead)


def _vmem_budget_bytes():
    """~85% of this chip's per-TensorCore VMEM (64 MiB v7x, 128 MiB v5e/v6e)."""
    try:
        cap = int(pltpu.get_tpu_info().vmem_capacity_bytes)
    except Exception:
        cap = 64 << 20      # conservative fallback: v7x per-TensorCore VMEM
    return int(cap * 0.85)


def _choose_tiles(M, E, h_bytes, vmem_budget):
    """Pick (tm, tn) so double-buffered in/out tiles + weight fit the budget."""
    w_bytes = h_bytes
    o_bytes = h_bytes
    b_bytes = 4                      # bias kept in f32
    M8 = _round_up(max(M, 1), 8)

    # Output-column tile: keep the full (E, E) weight resident when its
    # double-buffered footprint fits in half the budget, else stream (E, tn)
    # column slabs with tn a multiple of 128.
    if 2 * E * E * w_bytes <= (vmem_budget - _SLACK) // 2:
        tn = E
    else:
        tn = _round_down((vmem_budget - _SLACK) // (4 * E * w_bytes), 128)
        tn = max(tn, 128)

    # Row tile: as large as the remaining VMEM allows, capped at _MAX_TILE_BYTES.
    rem = vmem_budget - _SLACK - 2 * E * tn * w_bytes - 2 * tn * b_bytes
    tm_vmem = max(rem, 0) // max(2 * E * h_bytes + 2 * tn * o_bytes, 1)
    tm_cap = _MAX_TILE_BYTES // max(E * h_bytes, 1)
    tm = min(tm_vmem, tm_cap, M8)
    tm = max(_round_down(tm, 8), 8)

    # Keep >= 2 row blocks so dimension_semantics=("parallel", ...) can shard
    # rows across the two TensorCores on v7x (harmless on single-TC v5e/v6e).
    if pl.cdiv(M, tm) < 2 and M8 >= 16:
        tm = max(8, _round_up(pl.cdiv(M8, 2), 8))
    return tm, tn


def _beta_attention_kernel(h_ref, w_ref, b_ref, o_ref):
    # h_ref: (tm, E) row tile; w_ref: (E, tn) = W^T column slab (same dtype as h);
    # b_ref: (1, tn) f32 bias slab; o_ref: (tm, tn) output tile.
    acc = jnp.dot(h_ref[...], w_ref[...], preferred_element_type=jnp.float32)
    acc = acc + b_ref[...]                            # bias-add in f32
    o_ref[...] = jnp.tanh(acc).astype(o_ref.dtype)    # tanh on EUP, cast on store


@jax.jit
def beta_attention(h, weight, bias):
    """h: (B, V, E); weight: (E, E) nn.Linear (out, in) layout; bias: (E,).

    Returns tanh(h @ weight.T + bias) in h's dtype.  Pass bf16 h for halved
    HBM traffic (accumulation / epilogue stay in f32).
    """
    B, V, E = h.shape
    M = B * V
    h2 = h.reshape(M, E)                              # free: no copy

    # One-time (per call, E^2-sized) layout prep; callers that reuse W across
    # many calls can hoist this outside.
    wT = weight.T.astype(h.dtype)                     # (E_in, E_out) for plain dot
    b2 = bias.astype(jnp.float32).reshape(1, E)

    h_bytes = h.dtype.itemsize
    vmem_budget = _vmem_budget_bytes()
    tm, tn = _choose_tiles(M, E, h_bytes, vmem_budget)
    gm = pl.cdiv(M, tm)
    gn = pl.cdiv(E, tn)

    need = (2 * tm * E * h_bytes + 2 * tm * tn * h_bytes
            + 2 * E * tn * h_bytes + 2 * tn * 4 + _SLACK)
    vmem_limit = int(min(vmem_budget, max(need + (4 << 20), 32 << 20)))

    cost = pl.CostEstimate(
        flops=2 * M * E * E,
        transcendentals=M * E,
        bytes_accessed=h_bytes * (2 * M * E + E * E) + 4 * E,
    )

    out2 = pl.pallas_call(
        _beta_attention_kernel,
        out_shape=jax.ShapeDtypeStruct((M, E), h.dtype),
        grid_spec=pltpu.PrefetchScalarGridSpec(
            num_scalar_prefetch=0,
            grid=(gn, gm),                            # rows innermost -> weight slab resident
            in_specs=[
                pl.BlockSpec((tm, E), lambda j, i: (i, 0)),   # h row tile
                pl.BlockSpec((E, tn), lambda j, i: (0, j)),   # W^T column slab
                pl.BlockSpec((1, tn), lambda j, i: (0, j)),   # f32 bias slab
            ],
            out_specs=pl.BlockSpec((tm, tn), lambda j, i: (i, j)),
        ),
        compiler_params=pltpu.CompilerParams(
            dimension_semantics=("parallel", "parallel"),     # no reduction axis
            vmem_limit_bytes=vmem_limit,
        ),
        cost_estimate=cost,
    )(h2, wT, b2)

    return out2.reshape(B, V, E)


if __name__ == "__main__":
    key = jax.random.PRNGKey(0)
    B, V, E = 2, 8, 32   # batch, #visits, embedding_dim

    k_h, k_w, k_b = jax.random.split(key, 3)
    # Deterministic parameter init mirroring nn.Linear's U(-1/sqrt(E), 1/sqrt(E))
    bound = 1.0 / float(E) ** 0.5
    weight = jax.random.uniform(k_w, (E, E), jnp.float32, -bound, bound)
    bias = jax.random.uniform(k_b, (E,), jnp.float32, -bound, bound)
    h = jax.random.normal(k_h, (B, V, E), jnp.float32)

    # f32 path
    beta = jax.block_until_ready(beta_attention(h, weight, bias))
    ref = jnp.tanh(h @ weight.T + bias)
    assert beta.shape == (B, V, E)
    assert beta.dtype == h.dtype
    assert jnp.allclose(beta, ref, atol=1e-5, rtol=1e-5)

    # bf16 streaming path (half HBM traffic; f32 accumulate + epilogue in-kernel)
    h_bf = h.astype(jnp.bfloat16)
    beta_bf = jax.block_until_ready(beta_attention(h_bf, weight, bias))
    ref_bf = jnp.tanh(
        h_bf.astype(jnp.float32)
        @ weight.T.astype(jnp.bfloat16).astype(jnp.float32)
        + bias
    )
    assert beta_bf.dtype == jnp.bfloat16
    assert jnp.allclose(beta_bf.astype(jnp.float32), ref_bf, atol=1.5e-2, rtol=0)

    print("KERNEL_OK")
</pallas_src>

<mosaic_0001>
module attributes {stable_mosaic.version = 11 : i64} {
  func.func @_beta_attention_kernel(%arg0: i32, %arg1: i32, %arg2: memref<8x32xf32, #tpu.memory_space<vmem>>, %arg3: memref<32x32xf32, #tpu.memory_space<vmem>>, %arg4: memref<1x32xf32, #tpu.memory_space<vmem>>, %arg5: memref<8x32xf32, #tpu.memory_space<vmem>>) attributes {dimension_semantics = [#tpu.dimension_semantics<parallel>, #tpu.dimension_semantics<parallel>], iteration_bounds = array<i64: 1, 2>, scalar_prefetch = 0 : i64, scratch_operands = 0 : i64, tpu.core_type = #tpu.core_type<tc>, window_params = [{transform_indices = @transform_0, window_bounds = array<i64: 8, 32>}, {transform_indices = @transform_1, window_bounds = array<i64: 32, 32>}, {transform_indices = @transform_2, window_bounds = array<i64: 1, 32>}, {transform_indices = @transform_3, window_bounds = array<i64: 8, 32>}]} {
    %c0 = arith.constant 0 : index
    %c0_0 = arith.constant 0 : index
    %0 = vector.load %arg2[%c0, %c0_0] : memref<8x32xf32, #tpu.memory_space<vmem>>, vector<8x32xf32>
    %c0_1 = arith.constant 0 : index
    %c0_2 = arith.constant 0 : index
    %1 = vector.load %arg3[%c0_1, %c0_2] : memref<32x32xf32, #tpu.memory_space<vmem>>, vector<32x32xf32>
    %cst = arith.constant dense<0.000000e+00> : vector<8x32xf32>
    %2 = tpu.matmul %0, %1, %cst {dimension_numbers = #tpu.dot_dimension_numbers<[1], [0], [0], [1], [0, 0, 1, 1], [], []>} : vector<8x32xf32>, vector<32x32xf32>, vector<8x32xf32> -> vector<8x32xf32>
    %c0_3 = arith.constant 0 : index
    %c0_4 = arith.constant 0 : index
    %3 = vector.load %arg4[%c0_3, %c0_4] : memref<1x32xf32, #tpu.memory_space<vmem>>, vector<1x32xf32>
    %4 = vector.broadcast %3 : vector<1x32xf32> to vector<8x32xf32>
    %5 = arith.addf %2, %4 : vector<8x32xf32>
    %6 = math.tanh %5 : vector<8x32xf32>
    %c0_5 = arith.constant 0 : index
    %c0_6 = arith.constant 0 : index
    %7 = vector.load %arg5[%c0_5, %c0_6] : memref<8x32xf32, #tpu.memory_space<vmem>>, vector<8x32xf32>
    tpu.vector_store %arg5[%c0_5, %c0_6], %6 {strides = array<i32>} : memref<8x32xf32, #tpu.memory_space<vmem>>, vector<8x32xf32>,
    return
  }
  func.func @transform_0(%arg0: i32, %arg1: i32) -> (i32, i32) {
    %c0_i32 = arith.constant 0 : i32
    %c0_i32_0 = arith.constant 0 : i32
    return %arg1, %c0_i32 : i32, i32
  }
  func.func @transform_1(%arg0: i32, %arg1: i32) -> (i32, i32) {
    %c0_i32 = arith.constant 0 : i32
    %c0_i32_0 = arith.constant 0 : i32
    return %c0_i32, %arg0 : i32, i32
  }
  func.func @transform_2(%arg0: i32, %arg1: i32) -> (i32, i32) {
    %c0_i32 = arith.constant 0 : i32
    %c0_i32_0 = arith.constant 0 : i32
    return %c0_i32, %arg0 : i32, i32
  }
  func.func @transform_3(%arg0: i32, %arg1: i32) -> (i32, i32) {
    %c0_i32 = arith.constant 0 : i32
    return %arg1, %arg0 : i32, i32
  }
}

</mosaic_0001>

<bundles_post_ra>
// kernel: beta_attention.1
= control target key start
LH: loop header
LB: loop body
LE: loop exit
PB: predicated region body
PF: predicated region fallthrough
CT: control target
= control target key end

     0   :  { %8 = vsyncpa [#allocation3], 0  ;;  %s644_s0 = inlined_call_operand.vmem [shape: f32[16,32], index: 0, kind: input, shape index: {}]   ;;  %s645_s1 = inlined_call_operand.vmem [shape: f32[32,32], index: 1, kind: input, shape index: {}]   ;;  %s646_s2 = inlined_call_operand.vmem [shape: f32[1,32], index: 2, kind: input, shape index: {}]   ;;  %s647_s3 = inlined_call_operand.hbm [shape: f32[16,32], index: 3, kind: output, shape index: {}]  }
   0x1   :  { %10 = vsyncpa [#allocation3 + $0x1], 0  ;;  %s530_s12 = smov 0   ;;  %s532_s13 = smov 0  }
   0x2   :  { %s534_s14 = smov 0   ;;  %s536_s15 = smov 0  }
   0x3   :  { %s538_s16 = smov 0   ;;  %s540_s17 = smov 0  }
   0x4 LB: > { %s358_s18 = sadd.s32 4294967295, %s508_s17   ;;  %s359_s19 = sadd.s32 4294967294, %s508_s17   ;;  %s508_s17 = sphi %s540_s17, %s16_s17   ;;  %s504_s16 = sphi %s538_s16, %s654_s16   ;;  %s500_s15 = sphi %s536_s15, %s653_s15   ;;  %s496_s14 = sphi %s534_s14, %s652_s14   ;;  %s492_s13 = sphi %s532_s13, %s651_s13   ;;  %s488_s12 = sphi %s530_s12, %s650_s12  }
   0x5   : > { %s25_s20 = sadd.s32 1, %s504_s16  ;;  %s115_s21 = sadd.s32 1, %s496_s14 }
   0x6   : > { %p26_p0 = scmp.ge.s32.totalorder %s25_s20, 2  ;;  %p125_p1 = scmp.ne.s32.totalorder %s496_s14, %s492_s13 }
   0x7   : > { %p126_p2 = scmp.eq.s32.totalorder %s358_s18, 1  ;;  %p131_p3 = scmp.ne.s32.totalorder %s492_s13, %s488_s12 }
   0x8   : > { %s656_s20 = smov (%p26_p0, %s25_s20), 0  ;;  %p132_p5 = scmp.eq.s32.totalorder %s359_s19, 1 }
   0x9   : > { %p570_p4 = por %p126_p2, %p125_p1  ;;  %s110_s23 = ssub.s32 %s504_s16, %s656_s20 }
   0xa   : > { %p364_p6 = scmp.ge.s32.totalorder %s508_s17, 1  ;;  %p113_p7 = scmp.eq.s32.totalorder %s110_s23, 0 }
   0xb   : > { %p577_p8 = por %p132_p5, %p131_p3  ;;  %p170_p9 = scmp.lt.s32.totalorder %s508_s17, 3 }
   0xc   : > { %s583_s25 = scalar_select %p113_p7, %s496_s14, %s115_s21  }
   0xd   : > { %p171_p10 = pnand %p364_p6, %p170_p9 }
   0xe   : > { %p200_p11 = scmp.lt.s32.totalorder (!%p171_p10), %s500_s15, 1  ;;  %s197_s18 = sand.u32 (!%p171_p10), 1, %s492_s13  }
   0xf   : > { %174 = sbr.rel (%p171_p10) target bundleno = 166 (0xa6), region = 32  ;;  %s365_s23 = sshll.u32 (!%p171_p10), %s197_s18, 3 }
  0x10   : > { %s369_s26 = sshll.u32 (!%p171_p10), %s500_s15, 3  ;;  %s199_s30 = scalar_lea.vmem (!%p171_p10), [#allocation2], %s365_s23 }
  0x11   : > { %s258_s29 = scalar_lea.hbm (!%p171_p10), %s647_s3, %s369_s26  ;;  %s260_s4 = sshll.u32 (!%p171_p10), %s199_s30, 4  ;;  %s261_s4 = int_to_ptr.vmem [resolvable:$true] %s260_s4 }
  0x12   : > { %s247_s6 = scalar_lea.sflag (!%p171_p10), [#allocation3], %s197_s18  ;;  %s450_s10 = scalar_lea.hbm (!%p171_p10), %s647_s3, 16 }
  0x14   : > { %v215_v0 = vld [vmem:[%s645_s1 + $0x18] sm:$0xff]  ;;  %v214_v1 = vld [vmem:[%s645_s1 + $0x10] sm:$0xff]  ;;  %v213_v2 = vld [vmem:[%s645_s1 + $0x8] sm:$0xff]  ;;  %s201_s5 = scalar_select %p200_p11, %s500_s15, 1  ;;  %vm220_vm0 = vcmask 261120  }
  0x15   : > { %236 = vmatpush.msra.mxu0 %v215_v0  ;;  %v212_v3 = vld [vmem:[%s645_s1] sm:$0xff] }
  0x16   : > { %s366_s8 = sshll.u32 %s201_s5, 3  ;;  %v427_v5 = vld [vmem:[%s646_s2] ss:$0 sm:$0xff]  ;;  %s262_s5 = sshll.u32 %s258_s29, 4  ;;  %s263_s5 = int_to_ptr.hbm [resolvable:$true] %s262_s5 }
  0x17   : > { %237 = vmatpush.msra.mxu0 %v214_v1  ;;  %s203_s11 = scalar_lea.vmem %s644_s0, %s366_s8  ;;  %s444_s7 = sshra.s32 %s263_s5, 4  ;;  %s445_s7 = int_to_ptr.hbm [resolvable:$true] %s444_s7 }
  0x18   : > { %v211_v4 = vld [vmem:[%s203_s11] sm:$0xff]  ;;  %s446_s15 = scalar_lea.hbm %s445_s7, 8  ;;  %p451_p1 = scmp.lt.s32.totalorder %s445_s7, %s647_s3 }
  0x19   : > { %238 = vmatpush.msra.mxu0 %v213_v2  ;;  %p447_p12 = scmp.ne.s32.totalorder %s445_s7, %s446_s15  ;;  %p452_p2 = scmp.lt.s32.totalorder %s450_s10, %s446_s15 }
  0x1b   : > { %239 = vmatpush.msra.mxu0 %v212_v3  ;;  %p448_p13 = pnand %p447_p12, %p570_p4  ;;  %p453_p3 = por %p452_p2, %p451_p1 }
  0x1c   : > { %367 = vmatmul.msk.f32.vlgmr.msra.gmra.mxu0 %vm220_vm0, %v211_v4 }
  0x1d   : > { %p449_p0 = pneg %p448_p13 }
  0x1f   : > { %p454_p5 = pnand %p453_p3, %p449_p0 }
  0x99   : > { %v241_v6 = vpop.f32.mrf.mxu0 }
  0x9a   : > { %v242_v7 = vadd.f32 %v427_v5, %v241_v6 }
  0x9c   : > { %428 = vtanh.f32 %v242_v7 }
  0xa2   : > { %v429_v8 = vpop.eup %428 }
  0xa3   : > { %245 = vst.msk [vmem:[%s199_s30] sm:$0xff] %vm220_vm0, %v429_v8 }
  0xa4   : > { %457 = shalt.err (!%p454_p5)
}
  0xa5   : > { %372 = dma.vmem_to_hbm [thread:$0]  (%p570_p4), %s261_s4, 128, %s263_s5, %s247_s6  }
  0xa6 PF: > { %p378_p6 = scmp.ge.s32.totalorder %s508_s17, 2  ;;  %s274_s18 = sand.u32 1, %s488_s12  }
  0xa7   : > { %s275_s21 = scalar_lea.sflag [#allocation3], %s274_s18 }
  0xa8   : > { %p375_p7 = pnand %p378_p6, %p577_p8 }
  0xaa   : > { %p376_p9 = pneg %p375_p7 }
  0xac   : > { %483 = dma.done.wait (%p376_p9), %s275_s21, 128  }
  0xad   : > { %485 = vsyncadd (%p376_p9), %s275_s21, 4294967168  ;;  %s16_s17 = sadd.s32 1, %s508_s17   ;;  %s650_s12 = smov %s492_s13 }
  0xae   : > { %p13_p10 = scmp.ge.s32.totalorder %s16_s17, 4   ;;  %s651_s13 = smov %s496_s14 }
  0xaf   : > { %s652_s14 = smov %s583_s25  ;;  %s653_s15 = smov %s504_s16 }
  0xb0   : > { %s654_s16 = smov %s656_s20  ;;  %15 = sbr.rel (!%p13_p10) target bundleno = 4 (0x4), region = 73 }
  0xb5   :  { %281 = vsyncpa [#allocation3], 1 }
  0xb6   :  { %283 = vsyncpa [#allocation3 + $0x1], 1 }

</bundles_post_ra>
